<compile_context>
chip_gen: v7x
topology: tpu7x:2x2x1
jax: 0.10.0
libtpu: 0.0.40
codegen_flags: <defaults>
</compile_context>

<pallas_src>
from functools import partial

import jax
import jax.numpy as jnp
from jax.experimental import pallas as pl
from jax.experimental.pallas import tpu as pltpu

LANE = 128


def _tensorcores_per_chip() -> int:
    """2 on v7x (2 TensorCores/chip), 1 on v5e/v6e."""
    try:
        kind = jax.devices()[0].device_kind.lower()
    except Exception:
        return 1
    return 2 if "v7" in kind else 1


def _hinge_kernel(x_ref, o_ref, *, is_real, tile_rows, valid_rows,
                  blocks_per_slice, num_slices):
    if num_slices == 1:
        p, i = 0, pl.program_id(0)
    else:
        p, i = pl.program_id(0), pl.program_id(1)

    @pl.when(i == 0)
    def _():
        o_ref[...] = jnp.zeros_like(o_ref)

    x = x_ref[...]
    # Sign baked at trace time: 2 VALU ops (sub/add + max) per vreg, in the
    # input's native dtype (bf16 VPU on v6e/v7x); upconvert for the accumulate.
    hinge = jnp.maximum(1.0 - x, 0.0) if is_real else jnp.maximum(1.0 + x, 0.0)
    hinge = hinge.astype(jnp.float32)

    # Logical first row of this step's block.  Duplicate tail steps of the
    # 2-core split keep their logical index even though their DMA was clamped
    # to the last real block, so they fold in exactly 0.
    row0 = (p * blocks_per_slice + i) * tile_rows
    needs_mask = row0 + tile_rows > valid_rows

    @pl.when(jnp.logical_not(needs_mask))
    def _():
        # (tile_rows, 128) -> (tile_rows//8, 8, 128) is layout-preserving; the
        # axis-0 sum is a chain of vreg adds on the VPU (no XLU).
        o_ref[...] += hinge.reshape(-1, 8, LANE).sum(axis=0)

    @pl.when(needs_mask)
    def _():
        rows = row0 + jax.lax.broadcasted_iota(jnp.int32, (tile_rows, 1), 0)
        # SELECT (not multiply): out-of-bounds rows can hold NaN/Inf garbage.
        masked = jnp.where(rows < valid_rows, hinge, 0.0)
        o_ref[...] += masked.reshape(-1, 8, LANE).sum(axis=0)


def hinge_loss(logits, is_real, *, tile_rows=None,
               target_block_bytes=4 * 1024 * 1024):
    """Pallas implementation of HingeLoss.forward(logits, is_real).

    `is_real` must be a static Python bool (as in the PyTorch module, where it
    selects a trace-time branch).
    """
    is_real = bool(is_real)
    x = logits.reshape(-1)            # native dtype; contiguous flatten
    n = int(x.shape[0])
    assert n > 0

    # Misaligned (<128-element) tail: summed with plain JAX (no full-array pad).
    n_main = (n // LANE) * LANE
    tail_sum = None
    if n_main < n:
        t = x[n_main:].astype(jnp.float32)
        th = jnp.maximum(1.0 - t, 0.0) if is_real else jnp.maximum(1.0 + t, 0.0)
        tail_sum = jnp.sum(th)
        if n_main == 0:               # tiny input: nothing left for the kernel
            return tail_sum * jnp.float32(1.0 / n)
        # Only in the misaligned case does this prefix slice cost a copy; the
        # common 128-aligned NCHW case below is a zero-copy reshape.
        x = x[:n_main]

    rows_total = n_main // LANE
    x2 = x.reshape(rows_total, LANE)

    # Block row count: multiple of 8, targeting ~target_block_bytes of HBM
    # traffic per grid step (constant bytes/step regardless of dtype).
    itemsize = jnp.dtype(x2.dtype).itemsize
    rows_padded = -(-rows_total // 8) * 8
    if tile_rows is None:
        tile_rows = max(8, (target_block_bytes // (LANE * itemsize)) // 8 * 8)
    else:
        tile_rows = max(8, -(-int(tile_rows) // 8) * 8)
    tile_rows = min(tile_rows, rows_padded)

    num_blocks = -(-rows_total // tile_rows)
    num_slices = min(_tensorcores_per_chip(), num_blocks)
    blocks_per_slice = -(-num_blocks // num_slices)

    kernel = partial(_hinge_kernel, is_real=is_real, tile_rows=tile_rows,
                     valid_rows=rows_total, blocks_per_slice=blocks_per_slice,
                     num_slices=num_slices)
    out_shape = jax.ShapeDtypeStruct((num_slices * 8, LANE), jnp.float32)

    if num_slices == 1:
        grid = (num_blocks,)
        in_spec = pl.BlockSpec((tile_rows, LANE), lambda i: (i, 0))
        out_spec = pl.BlockSpec((8, LANE), lambda i: (0, 0))
        semantics_options = [("arbitrary",)]
    else:
        grid = (num_slices, blocks_per_slice)
        nb, bps = num_blocks, blocks_per_slice
        # Clamp so the (possibly empty) tail steps of the core split re-read
        # the last real block; their contribution is masked to 0 in-kernel.
        in_spec = pl.BlockSpec(
            (tile_rows, LANE),
            lambda p, i: (jnp.minimum(p * bps + i, nb - 1), 0))
        out_spec = pl.BlockSpec((8, LANE), lambda p, i: (p, 0))
        # Prefer a true per-core split on 2-TC chips; fall back if unsupported.
        semantics_options = [(pltpu.CORE_PARALLEL, pltpu.ARBITRARY),
                             ("parallel", "arbitrary")]

    def _call(dim_sem):
        return pl.pallas_call(
            kernel,
            out_shape=out_shape,
            grid=grid,
            in_specs=[in_spec],
            out_specs=out_spec,
            compiler_params=pltpu.CompilerParams(
                dimension_semantics=dim_sem,
                vmem_limit_bytes=48 * 1024 * 1024),
        )(x2)

    out, err = None, None
    for dim_sem in semantics_options:
        try:
            out = _call(dim_sem)
            break
        except Exception as e:        # e.g. CORE_PARALLEL not supported
            err = e
    if out is None:
        raise err

    total = jnp.sum(out)
    if tail_sum is not None:
        total = total + tail_sum
    return total * jnp.float32(1.0 / n)


def hinge_loss_ref(logits, is_real):
    x = logits.astype(jnp.float32)
    if is_real:
        return jnp.mean(jnp.maximum(1.0 - x, 0.0))
    return jnp.mean(jnp.maximum(1.0 + x, 0.0))


if __name__ == "__main__":
    key = jax.random.PRNGKey(0)
    # Discriminator (patch-GAN style) logits: (N, C, H, W) = (2, 4, 16, 16).
    logits = jax.random.normal(key, (2, 4, 16, 16), dtype=jnp.float32)
    # Odd element count (4800) -> plain-JAX tail + masked ragged block path.
    logits_odd = jax.random.normal(jax.random.PRNGKey(1), (1, 3, 40, 40),
                                   dtype=jnp.float32)
    logits_bf16 = logits.astype(jnp.bfloat16)

    ok = True

    def check(name, got, want, rtol=1e-5, atol=1e-5):
        global ok
        got = jax.block_until_ready(got)
        want = jax.block_until_ready(want)
        if not jnp.allclose(got, want, rtol=rtol, atol=atol):
            ok = False
            print(f"MISMATCH {name}: pallas={got} ref={want}")

    for is_real in (True, False):
        # Single large block, zero-copy path.
        check(f"aligned is_real={is_real}",
              hinge_loss(logits, is_real), hinge_loss_ref(logits, is_real))
        # Forced tiny tile: multi-block streaming accumulate (+ 2-core split
        # across blocks on v7x).
        check(f"multiblock is_real={is_real}",
              hinge_loss(logits, is_real, tile_rows=8),
              hinge_loss_ref(logits, is_real))
        # Misaligned n: JAX tail + ragged masked last block (+ fully masked
        # duplicate tail step when the 2-core split is active).
        check(f"ragged is_real={is_real}",
              hinge_loss(logits_odd, is_real, tile_rows=8),
              hinge_loss_ref(logits_odd, is_real))
        # bf16 streaming path (hinge in bf16, accumulate in f32).
        check(f"bf16 is_real={is_real}",
              hinge_loss(logits_bf16, is_real),
              hinge_loss_ref(logits_bf16, is_real), rtol=2e-2, atol=2e-2)

    if ok:
        print("KERNEL_OK")
</pallas_src>

<mosaic_0001>
module attributes {stable_mosaic.version = 11 : i64} {
  func.func @_hinge_kernel(%arg0: i32, %arg1: memref<16x128xf32, #tpu.memory_space<vmem>>, %arg2: memref<8x128xf32, #tpu.memory_space<vmem>>) attributes {dimension_semantics = [#tpu.dimension_semantics<arbitrary>], iteration_bounds = array<i64: 1>, scalar_prefetch = 0 : i64, scratch_operands = 0 : i64, tpu.core_type = #tpu.core_type<tc>, window_params = [{transform_indices = @transform_0, window_bounds = array<i64: 16, 128>}, {pipeline_mode = #tpu.pipeline_mode<synchronous>, transform_indices = @transform_1, window_bounds = array<i64: 8, 128>}]} {
    %c0_i32 = arith.constant 0 : i32
    %0 = arith.cmpi eq, %arg0, %c0_i32 : i32
    %1 = arith.extui %0 : i1 to i32
    %c0_i32_0 = arith.constant 0 : i32
    %2 = arith.cmpi ne, %1, %c0_i32_0 : i32
    scf.if %2 {
      %cst_8 = arith.constant 0.000000e+00 : f32
      %17 = vector.broadcast %cst_8 : f32 to vector<8x128xf32>
      %c0_9 = arith.constant 0 : index
      %c0_10 = arith.constant 0 : index
      %18 = vector.load %arg2[%c0_9, %c0_10] : memref<8x128xf32, #tpu.memory_space<vmem>>, vector<8x128xf32>
      tpu.vector_store %arg2[%c0_9, %c0_10], %17 {strides = array<i32>} : memref<8x128xf32, #tpu.memory_space<vmem>>, vector<8x128xf32>,
    } else {
    }
    %c0 = arith.constant 0 : index
    %c0_1 = arith.constant 0 : index
    %3 = vector.load %arg1[%c0, %c0_1] : memref<16x128xf32, #tpu.memory_space<vmem>>, vector<16x128xf32>
    %cst = arith.constant 1.000000e+00 : f32
    %4 = vector.broadcast %cst : f32 to vector<16x128xf32>
    %5 = arith.subf %4, %3 : vector<16x128xf32>
    %cst_2 = arith.constant 0.000000e+00 : f32
    %6 = vector.broadcast %cst_2 : f32 to vector<16x128xf32>
    %7 = arith.maximumf %5, %6 : vector<16x128xf32>
    %c0_i32_3 = arith.constant 0 : i32
    %8 = arith.addi %c0_i32_3, %arg0 : i32
    %c16_i32 = arith.constant 16 : i32
    %9 = arith.muli %8, %c16_i32 : i32
    %c16_i32_4 = arith.constant 16 : i32
    %10 = arith.addi %9, %c16_i32_4 : i32
    %c16_i32_5 = arith.constant 16 : i32
    %11 = arith.cmpi sgt, %10, %c16_i32_5 : i32
    %true = arith.constant true
    %12 = arith.xori %11, %true : i1
    %13 = arith.extui %12 : i1 to i32
    %c0_i32_6 = arith.constant 0 : i32
    %14 = arith.cmpi ne, %13, %c0_i32_6 : i32
    scf.if %14 {
      %c0_8 = arith.constant 0 : index
      %c0_9 = arith.constant 0 : index
      %17 = vector.load %arg2[%c0_8, %c0_9] : memref<8x128xf32, #tpu.memory_space<vmem>>, vector<8x128xf32>
      %18 = vector.shape_cast %7 : vector<16x128xf32> to vector<2x8x128xf32>
      %cst_10 = arith.constant dense<0.000000e+00> : vector<8x128xf32>
      %19 = vector.multi_reduction <add>, %18, %cst_10 [0] : vector<2x8x128xf32> to vector<8x128xf32>
      %20 = arith.addf %17, %19 : vector<8x128xf32>
      %c0_11 = arith.constant 0 : index
      %c0_12 = arith.constant 0 : index
      %21 = vector.load %arg2[%c0_11, %c0_12] : memref<8x128xf32, #tpu.memory_space<vmem>>, vector<8x128xf32>
      tpu.vector_store %arg2[%c0_11, %c0_12], %20 {strides = array<i32>} : memref<8x128xf32, #tpu.memory_space<vmem>>, vector<8x128xf32>,
    } else {
    }
    %15 = arith.extui %11 : i1 to i32
    %c0_i32_7 = arith.constant 0 : i32
    %16 = arith.cmpi ne, %15, %c0_i32_7 : i32
    scf.if %16 {
      %17 = tpu.iota {dimensions = array<i32: 0>} : vector<16x1xi32>
      %18 = vector.broadcast %9 : i32 to vector<16x1xi32>
      %19 = arith.addi %18, %17 : vector<16x1xi32>
      %c16_i32_8 = arith.constant 16 : i32
      %20 = vector.broadcast %c16_i32_8 : i32 to vector<16x1xi32>
      %21 = arith.cmpi slt, %19, %20 : vector<16x1xi32>
      %cst_9 = arith.constant 0.000000e+00 : f32
      %22 = vector.shape_cast %21 : vector<16x1xi1> to vector<16x1xi1>
      %23 = vector.broadcast %22 : vector<16x1xi1> to vector<16x128xi1>
      %24 = vector.broadcast %cst_9 : f32 to vector<16x128xf32>
      %25 = arith.select %23, %7, %24 : vector<16x128xi1>, vector<16x128xf32>
      %c0_10 = arith.constant 0 : index
      %c0_11 = arith.constant 0 : index
      %26 = vector.load %arg2[%c0_10, %c0_11] : memref<8x128xf32, #tpu.memory_space<vmem>>, vector<8x128xf32>
      %27 = vector.shape_cast %25 : vector<16x128xf32> to vector<2x8x128xf32>
      %cst_12 = arith.constant dense<0.000000e+00> : vector<8x128xf32>
      %28 = vector.multi_reduction <add>, %27, %cst_12 [0] : vector<2x8x128xf32> to vector<8x128xf32>
      %29 = arith.addf %26, %28 : vector<8x128xf32>
      %c0_13 = arith.constant 0 : index
      %c0_14 = arith.constant 0 : index
      %30 = vector.load %arg2[%c0_13, %c0_14] : memref<8x128xf32, #tpu.memory_space<vmem>>, vector<8x128xf32>
      tpu.vector_store %arg2[%c0_13, %c0_14], %29 {strides = array<i32>} : memref<8x128xf32, #tpu.memory_space<vmem>>, vector<8x128xf32>,
    } else {
    }
    return
  }
  func.func @transform_0(%arg0: i32) -> (i32, i32) {
    %c0_i32 = arith.constant 0 : i32
    %c0_i32_0 = arith.constant 0 : i32
    return %arg0, %c0_i32 : i32, i32
  }
  func.func @transform_1(%arg0: i32) -> (i32, i32) {
    %c0_i32 = arith.constant 0 : i32
    %c0_i32_0 = arith.constant 0 : i32
    %c0_i32_1 = arith.constant 0 : i32
    return %c0_i32, %c0_i32_0 : i32, i32
  }
}

</mosaic_0001>

<bundles_post_ra>
// kernel: tpu_custom_call.1
= control target key start
LH: loop header
LB: loop body
LE: loop exit
PB: predicated region body
PF: predicated region fallthrough
CT: control target
= control target key end

     0   :  { %6 = vsyncpa [#allocation3], 0  ;;  %s172_s0 = inlined_call_operand.hbm [shape: f32[16,128], index: 0, kind: input, shape index: {}]   ;;  %s173_s1 = inlined_call_operand.hbm [shape: f32[8,128], index: 1, kind: output, shape index: {}]  }
   0x1   :  { %7 = vsyncpa [#allocation4], 0  ;;  %s134_s6 = smov [#allocation2]   ;;  %s86_s10 = scalar_lea.hbm %s172_s0, 256 }
   0x2   :  { %s13_s7 = sshll.u32 %s134_s6, 4  ;;  %p87_p0 = scmp.ne.s32.totalorder %s172_s0, %s86_s10  ;;  %s14_s7 = int_to_ptr.vmem [resolvable:$true] %s13_s7 }
   0x3   :  { %p90_p1 = scmp.lt.u32.totalorder %s86_s10, %s172_s0 }
   0x5   :  { %p92_p2 = pnand %p90_p1, %p87_p0 }
   0x7   :  { %95 = shalt.err (!%p92_p2)
}
   0x8   :  { %s96_s15 = scalar_lea.vmem %s14_s7, 256  ;;  %p101_p4 = scmp.lt.s32.totalorder %s14_s7, %s14_s7 }
   0x9   :  { %p97_p3 = scmp.ne.s32.totalorder %s14_s7, %s96_s15  ;;  %p102_p5 = scmp.lt.s32.totalorder %s96_s15, %s96_s15 }
   0xb   :  { %p103_p6 = por %p102_p5, %p101_p4 }
   0xd   :  { %p104_p7 = pnand %p103_p6, %p97_p3 }
   0xf   :  { %107 = shalt.err (!%p104_p7)
}
  0x10   :  { %s135_s16 = smov 128   ;;  %s136_s17 = smov 8  }
  0x11   :  { %19 = dma.hbm_to_vmem [thread:$0]  %s172_s0, 256, %s14_s7, [#allocation3], %s135_s16, %s135_s16, %s136_s17  }
  0x12   :  { %130 = dma.done.wait [#allocation3], 256  }
  0x13   :  { %131 = vsyncadd [#allocation3], 4294967040  ;;  %v28_v0 = vld [vmem:[#allocation2] sm:$0xff]  ;;  %v29_v1 = vld [vmem:[#allocation2 + $0x8] sm:$0xff]  ;;  %s137_s20 = smov [#allocation5]  }
  0x14   :  { %v30_v2 = vsub.f32 1.0, %v28_v0  ;;  %v31_v3 = vsub.f32 1.0, %v29_v1  ;;  %s72_s21 = sshll.u32 %s137_s20, 4  ;;  %s73_s21 = int_to_ptr.vmem [resolvable:$true] %s72_s21 }
  0x15   :  { %s108_s22 = scalar_lea.vmem %s73_s21, 128  ;;  %p113_p9 = scmp.lt.s32.totalorder %s73_s21, %s73_s21 }
  0x16   :  { %v32_v4 = vmax.f32 %v30_v2, 0.0  ;;  %v33_v5 = vmax.f32 %v31_v3, 0.0  ;;  %p109_p8 = scmp.ne.s32.totalorder %s73_s21, %s108_s22  ;;  %p114_p10 = scmp.lt.s32.totalorder %s108_s22, %s108_s22 }
  0x18   :  { %v42_v6 = vadd.f32 %v33_v5, %v32_v4  ;;  %p115_p11 = por %p114_p10, %p113_p9 }
  0x1a   :  { %44 = vst [vmem:[#allocation5] sm:$0xff] %v42_v6  ;;  %p116_p12 = pnand %p115_p11, %p109_p8 }
  0x1c   :  { %119 = shalt.err (!%p116_p12)
}
  0x1d   :  { %s120_s24 = scalar_lea.hbm %s173_s1, 128 }
  0x1e   :  { %p121_p13 = scmp.ne.s32.totalorder %s173_s1, %s120_s24  ;;  %p124_p0 = scmp.lt.u32.totalorder %s120_s24, %s173_s1 }
  0x20   :  { %p126_p1 = pnand %p124_p0, %p121_p13 }
  0x22   :  { %129 = shalt.err (!%p126_p1)
}
  0x23   :  { %75 = dma.vmem_to_hbm [thread:$0]  %s73_s21, 128, %s173_s1, [#allocation4]  }
  0x24   :  { %132 = dma.done.wait [#allocation4], 128  }
  0x25   :  { %133 = vsyncadd [#allocation4], 4294967168 }
  0x26   :  { %79 = vsyncpa [#allocation3], 1 }
  0x27   :  { %80 = vsyncpa [#allocation4], 1 }

</bundles_post_ra>
